<compile_context>
chip_gen: v6e
topology: v6e:2x2x1
jax: 0.10.0
libtpu: 0.0.40
codegen_flags: <defaults>
</compile_context>

<pallas_src>
import jax
import jax.numpy as jnp
from jax.experimental import pallas as pl
from jax.experimental.pallas import tpu as pltpu


def _vmem_capacity_bytes():
    """Per-core VMEM capacity; conservative fallback if the query is unavailable."""
    try:
        cap = int(pltpu.get_tpu_info().vmem_capacity_bytes)
        if cap > 0:
            return cap
    except Exception:
        pass
    return 64 * 1024 * 1024  # v7x per-TensorCore VMEM (safe lower bound)


def _choose_tile_rows(H, W, per_row_bytes, budget_bytes):
    """Largest r with r | H, r*W lane-dense (multiple of 128, or full H*W),
    and double-buffered in+out tiles within budget."""
    legal = [r for r in range(1, H + 1)
             if H % r == 0 and ((r * W) % 128 == 0 or r == H)]
    fitting = [r for r in legal if r * per_row_bytes <= budget_bytes]
    if fitting:
        return max(fitting)
    # Nothing fits the budget: take the smallest legal tile (correctness first).
    # TODO(synk): switch to a cdiv grid with a masked tail for awkward H.
    return min(legal)


def _make_kernel(num_groups, width, channel_counts, channel_offsets, out_dtype):
    G = num_groups
    W = width
    n_levels = max(W.bit_length() - 1, 0)  # log2(W); W is a power of two

    def kernel(*refs):
        x_refs = refs[:G]
        o_refs = refs[G:]
        for g in range(G):
            Cg = channel_counts[g]
            x = x_refs[g][...].astype(jnp.float32)          # (Cg, T), lane-dense load
            T = x.shape[-1]

            # Per-channel affine; channel index taken in the *concatenated*
            # tensor.  Trace-time constants (iota + scalars) -> no param DMA.
            ch = (jax.lax.broadcasted_iota(jnp.int32, (Cg, 1), 0)
                  + channel_offsets[g]).astype(jnp.float32)
            y = x * (1.0 + 0.1 * ch) + 0.01 * ch

            # Horizontal flip: reverse every W-long segment of the flattened
            # spatial (lane) axis.  log2(W) butterfly passes of
            # z[k] = y[k ^ (1 << b)]; composition gives y[k ^ (W-1)].
            # The select mask is derived from a rolled iota so correctness is
            # independent of the roll direction convention.
            if n_levels:
                lane = jax.lax.broadcasted_iota(jnp.int32, (Cg, T), 1)
                for b in range(n_levels):
                    s = 1 << b
                    src = lane ^ s                                   # wanted source
                    fwd = pltpu.roll(y, shift=s, axis=1)
                    bwd = pltpu.roll(y, shift=T - s, axis=1)
                    use_fwd = pltpu.roll(lane, shift=s, axis=1) == src
                    y = jnp.where(use_fwd, fwd, bwd)

            o_refs[g][...] = y.astype(out_dtype)                     # lane-dense store

    return kernel


def data_augmentation_group(x_groups, training=True, *, tile_budget_bytes=None):
    """JAX/Pallas equivalent of DataAugmentationGroup.forward."""
    x_groups = tuple(x_groups)
    if not training:
        return x_groups  # identity passthrough in eval mode

    G = len(x_groups)
    N, _, H, W = x_groups[0].shape
    dtype = x_groups[0].dtype
    for g in x_groups:
        assert g.ndim == 4 and g.shape[0] == N and g.shape[2] == H and g.shape[3] == W
        assert g.dtype == dtype
    if W & (W - 1):
        # TODO(synk): support non-power-of-two W (segmented lane permutation).
        raise NotImplementedError("horizontal-flip butterfly requires power-of-two W")

    Cs = [int(g.shape[1]) for g in x_groups]
    offsets = [int(sum(Cs[:g])) for g in range(G)]
    S = H * W

    # Lane-dense layout: merge H, W into one contiguous minor axis (free reshape).
    x_flat = [g.reshape(N, c, S) for g, c in zip(x_groups, Cs)]

    # Per-generation tile sizing: double-buffered (in + out) tiles across all
    # groups stay within ~1/4 of this chip's VMEM; scoped limit at ~1/2.
    itemsize = jnp.dtype(dtype).itemsize
    capacity = _vmem_capacity_bytes()
    if tile_budget_bytes is None:
        tile_budget_bytes = capacity // 4
    vmem_limit = min(capacity // 2, 128 * 1024 * 1024)
    per_row_bytes = 2 * 2 * sum(Cs) * W * itemsize      # 2 buffers x (in + out)
    tile_rows = _choose_tile_rows(H, W, per_row_bytes, tile_budget_bytes)
    T = tile_rows * W
    n_sblocks = S // T

    # Megacore balance: larger parallel axis first; both axes independent.
    if n_sblocks >= N:
        grid = (n_sblocks, N)

        def index_map(s, n):
            return (n, 0, s)
    else:
        grid = (N, n_sblocks)

        def index_map(n, s):
            return (n, 0, s)

    in_specs = [pl.BlockSpec((None, c, T), index_map) for c in Cs]
    out_specs = [pl.BlockSpec((None, c, T), index_map) for c in Cs]
    out_shape = tuple(jax.ShapeDtypeStruct((N, c, S), dtype) for c in Cs)

    kernel = _make_kernel(G, W, tuple(Cs), tuple(offsets), dtype)

    outs = pl.pallas_call(
        kernel,
        out_shape=out_shape,
        grid_spec=pltpu.PrefetchScalarGridSpec(
            num_scalar_prefetch=0,
            grid=grid,
            in_specs=in_specs,
            out_specs=out_specs,
        ),
        compiler_params=pltpu.CompilerParams(
            dimension_semantics=("parallel", "parallel"),
            vmem_limit_bytes=int(vmem_limit),
        ),
    )(*x_flat)

    return tuple(o.reshape(N, c, H, W) for o, c in zip(outs, Cs))


def _reference(x_groups):
    """Pure-JAX reference of the same synthetic augmentation (cat -> aug -> split)."""
    split_channels = [g.shape[1] for g in x_groups]
    dtype = x_groups[0].dtype
    x = jnp.concatenate([g.astype(jnp.float32) for g in x_groups], axis=1)
    C = x.shape[1]
    c = jnp.arange(C, dtype=jnp.float32).reshape(1, C, 1, 1)
    y = x * (1.0 + 0.1 * c) + 0.01 * c
    y = y[..., ::-1]  # horizontal flip over W
    outs, start = [], 0
    for cnt in split_channels:
        outs.append(y[:, start:start + cnt].astype(dtype))
        start += cnt
    return tuple(outs)


def _check(out, ref):
    for o, r in zip(out, ref):
        assert o.shape == r.shape and o.dtype == r.dtype
        assert jnp.allclose(o.astype(jnp.float32), r.astype(jnp.float32),
                            atol=1e-5, rtol=1e-5), float(
            jnp.max(jnp.abs(o.astype(jnp.float32) - r.astype(jnp.float32))))


if __name__ == "__main__":
    key = jax.random.PRNGKey(0)
    k1, k2, k3, k4 = jax.random.split(key, 4)

    # Case 1: two channel groups (unequal channel counts exercise the split), NCHW.
    x0 = jax.random.normal(k1, (2, 4, 16, 16), dtype=jnp.float32)
    x1 = jax.random.normal(k2, (2, 2, 16, 16), dtype=jnp.float32)
    x_groups = (x0, x1)
    out = data_augmentation_group(x_groups, training=True)
    out = jax.tree_util.tree_map(jax.block_until_ready, out)
    _check(out, _reference(x_groups))

    # Case 2: force multi-block tiling along the flattened spatial axis
    # (small tile budget -> T = 128, several grid steps per image).
    y0 = jax.random.normal(k3, (2, 3, 32, 32), dtype=jnp.float32)
    y1 = jax.random.normal(k4, (2, 1, 32, 32), dtype=jnp.float32)
    y_groups = (y0, y1)
    out2 = data_augmentation_group(y_groups, training=True, tile_budget_bytes=8192)
    out2 = jax.tree_util.tree_map(jax.block_until_ready, out2)
    _check(out2, _reference(y_groups))

    # Eval mode: identity passthrough.
    out_eval = data_augmentation_group(x_groups, training=False)
    for o, xi in zip(out_eval, x_groups):
        assert o.shape == xi.shape
        assert jnp.allclose(o, xi)

    print("KERNEL_OK")
</pallas_src>

<mosaic_0001>
module attributes {stable_mosaic.version = 11 : i64} {
  func.func @kernel(%arg0: i32, %arg1: i32, %arg2: memref<1x4x256xf32, #tpu.memory_space<vmem>>, %arg3: memref<1x2x256xf32, #tpu.memory_space<vmem>>, %arg4: memref<1x4x256xf32, #tpu.memory_space<vmem>>, %arg5: memref<1x2x256xf32, #tpu.memory_space<vmem>>) attributes {dimension_semantics = [#tpu.dimension_semantics<parallel>, #tpu.dimension_semantics<parallel>], iteration_bounds = array<i64: 2, 1>, scalar_prefetch = 0 : i64, scratch_operands = 0 : i64, tpu.core_type = #tpu.core_type<tc>, window_params = [{transform_indices = @transform_0, window_bounds = array<i64: 1, 4, 256>}, {transform_indices = @transform_1, window_bounds = array<i64: 1, 2, 256>}, {transform_indices = @transform_2, window_bounds = array<i64: 1, 4, 256>}, {transform_indices = @transform_3, window_bounds = array<i64: 1, 2, 256>}]} {
    %c0 = arith.constant 0 : index
    %c0_0 = arith.constant 0 : index
    %c0_1 = arith.constant 0 : index
    %0 = vector.load %arg2[%c0, %c0_0, %c0_1] : memref<1x4x256xf32, #tpu.memory_space<vmem>>, vector<1x4x256xf32>
    %1 = vector.shape_cast %0 : vector<1x4x256xf32> to vector<4x256xf32>
    %2 = tpu.iota {dimensions = array<i32: 0>} : vector<4x1xi32>
    %c0_i32 = arith.constant 0 : i32
    %3 = vector.broadcast %c0_i32 : i32 to vector<4x1xi32>
    %4 = arith.addi %2, %3 : vector<4x1xi32>
    %5 = arith.sitofp %4 : vector<4x1xi32> to vector<4x1xf32>
    %cst = arith.constant 1.000000e-01 : f32
    %6 = vector.broadcast %cst : f32 to vector<4x1xf32>
    %7 = arith.mulf %6, %5 : vector<4x1xf32>
    %cst_2 = arith.constant 1.000000e+00 : f32
    %8 = vector.broadcast %cst_2 : f32 to vector<4x1xf32>
    %9 = arith.addf %8, %7 : vector<4x1xf32>
    %10 = vector.broadcast %9 : vector<4x1xf32> to vector<4x256xf32>
    %11 = arith.mulf %1, %10 : vector<4x256xf32>
    %cst_3 = arith.constant 0.00999999977 : f32
    %12 = vector.broadcast %cst_3 : f32 to vector<4x1xf32>
    %13 = arith.mulf %12, %5 : vector<4x1xf32>
    %14 = vector.broadcast %13 : vector<4x1xf32> to vector<4x256xf32>
    %15 = arith.addf %11, %14 : vector<4x256xf32>
    %16 = tpu.iota {dimensions = array<i32: 1>} : vector<4x256xi32>
    %c1_i32 = arith.constant 1 : i32
    %17 = vector.broadcast %c1_i32 : i32 to vector<4x256xi32>
    %18 = arith.xori %16, %17 : vector<4x256xi32>
    %c1_i32_4 = arith.constant 1 : i32
    %19 = tpu.dynamic_rotate %15 by %c1_i32_4 dim 1 : vector<4x256xf32>, i32 -> vector<4x256xf32>
    %c255_i32 = arith.constant 255 : i32
    %20 = tpu.dynamic_rotate %15 by %c255_i32 dim 1 : vector<4x256xf32>, i32 -> vector<4x256xf32>
    %c1_i32_5 = arith.constant 1 : i32
    %21 = tpu.dynamic_rotate %16 by %c1_i32_5 dim 1 : vector<4x256xi32>, i32 -> vector<4x256xi32>
    %22 = arith.cmpi eq, %21, %18 : vector<4x256xi32>
    %23 = arith.select %22, %19, %20 : vector<4x256xi1>, vector<4x256xf32>
    %c2_i32 = arith.constant 2 : i32
    %24 = vector.broadcast %c2_i32 : i32 to vector<4x256xi32>
    %25 = arith.xori %16, %24 : vector<4x256xi32>
    %c2_i32_6 = arith.constant 2 : i32
    %26 = tpu.dynamic_rotate %23 by %c2_i32_6 dim 1 : vector<4x256xf32>, i32 -> vector<4x256xf32>
    %c254_i32 = arith.constant 254 : i32
    %27 = tpu.dynamic_rotate %23 by %c254_i32 dim 1 : vector<4x256xf32>, i32 -> vector<4x256xf32>
    %c2_i32_7 = arith.constant 2 : i32
    %28 = tpu.dynamic_rotate %16 by %c2_i32_7 dim 1 : vector<4x256xi32>, i32 -> vector<4x256xi32>
    %29 = arith.cmpi eq, %28, %25 : vector<4x256xi32>
    %30 = arith.select %29, %26, %27 : vector<4x256xi1>, vector<4x256xf32>
    %c4_i32 = arith.constant 4 : i32
    %31 = vector.broadcast %c4_i32 : i32 to vector<4x256xi32>
    %32 = arith.xori %16, %31 : vector<4x256xi32>
    %c4_i32_8 = arith.constant 4 : i32
    %33 = tpu.dynamic_rotate %30 by %c4_i32_8 dim 1 : vector<4x256xf32>, i32 -> vector<4x256xf32>
    %c252_i32 = arith.constant 252 : i32
    %34 = tpu.dynamic_rotate %30 by %c252_i32 dim 1 : vector<4x256xf32>, i32 -> vector<4x256xf32>
    %c4_i32_9 = arith.constant 4 : i32
    %35 = tpu.dynamic_rotate %16 by %c4_i32_9 dim 1 : vector<4x256xi32>, i32 -> vector<4x256xi32>
    %36 = arith.cmpi eq, %35, %32 : vector<4x256xi32>
    %37 = arith.select %36, %33, %34 : vector<4x256xi1>, vector<4x256xf32>
    %c8_i32 = arith.constant 8 : i32
    %38 = vector.broadcast %c8_i32 : i32 to vector<4x256xi32>
    %39 = arith.xori %16, %38 : vector<4x256xi32>
    %c8_i32_10 = arith.constant 8 : i32
    %40 = tpu.dynamic_rotate %37 by %c8_i32_10 dim 1 : vector<4x256xf32>, i32 -> vector<4x256xf32>
    %c248_i32 = arith.constant 248 : i32
    %41 = tpu.dynamic_rotate %37 by %c248_i32 dim 1 : vector<4x256xf32>, i32 -> vector<4x256xf32>
    %c8_i32_11 = arith.constant 8 : i32
    %42 = tpu.dynamic_rotate %16 by %c8_i32_11 dim 1 : vector<4x256xi32>, i32 -> vector<4x256xi32>
    %43 = arith.cmpi eq, %42, %39 : vector<4x256xi32>
    %44 = arith.select %43, %40, %41 : vector<4x256xi1>, vector<4x256xf32>
    %c0_12 = arith.constant 0 : index
    %c0_13 = arith.constant 0 : index
    %c0_14 = arith.constant 0 : index
    %45 = vector.load %arg4[%c0_12, %c0_13, %c0_14] : memref<1x4x256xf32, #tpu.memory_space<vmem>>, vector<1x4x256xf32>
    %46 = vector.shape_cast %45 : vector<1x4x256xf32> to vector<4x256xf32>
    %47 = vector.shape_cast %44 : vector<4x256xf32> to vector<1x4x256xf32>
    tpu.vector_store %arg4[%c0_12, %c0_13, %c0_14], %47 {strides = array<i32>} : memref<1x4x256xf32, #tpu.memory_space<vmem>>, vector<1x4x256xf32>,
    %c0_15 = arith.constant 0 : index
    %c0_16 = arith.constant 0 : index
    %c0_17 = arith.constant 0 : index
    %48 = vector.load %arg3[%c0_15, %c0_16, %c0_17] : memref<1x2x256xf32, #tpu.memory_space<vmem>>, vector<1x2x256xf32>
    %49 = vector.shape_cast %48 : vector<1x2x256xf32> to vector<2x256xf32>
    %50 = tpu.iota {dimensions = array<i32: 0>} : vector<2x1xi32>
    %c4_i32_18 = arith.constant 4 : i32
    %51 = vector.broadcast %c4_i32_18 : i32 to vector<2x1xi32>
    %52 = arith.addi %50, %51 : vector<2x1xi32>
    %53 = arith.sitofp %52 : vector<2x1xi32> to vector<2x1xf32>
    %cst_19 = arith.constant 1.000000e-01 : f32
    %54 = vector.broadcast %cst_19 : f32 to vector<2x1xf32>
    %55 = arith.mulf %54, %53 : vector<2x1xf32>
    %cst_20 = arith.constant 1.000000e+00 : f32
    %56 = vector.broadcast %cst_20 : f32 to vector<2x1xf32>
    %57 = arith.addf %56, %55 : vector<2x1xf32>
    %58 = vector.broadcast %57 : vector<2x1xf32> to vector<2x256xf32>
    %59 = arith.mulf %49, %58 : vector<2x256xf32>
    %cst_21 = arith.constant 0.00999999977 : f32
    %60 = vector.broadcast %cst_21 : f32 to vector<2x1xf32>
    %61 = arith.mulf %60, %53 : vector<2x1xf32>
    %62 = vector.broadcast %61 : vector<2x1xf32> to vector<2x256xf32>
    %63 = arith.addf %59, %62 : vector<2x256xf32>
    %64 = tpu.iota {dimensions = array<i32: 1>} : vector<2x256xi32>
    %c1_i32_22 = arith.constant 1 : i32
    %65 = vector.broadcast %c1_i32_22 : i32 to vector<2x256xi32>
    %66 = arith.xori %64, %65 : vector<2x256xi32>
    %c1_i32_23 = arith.constant 1 : i32
    %67 = tpu.dynamic_rotate %63 by %c1_i32_23 dim 1 : vector<2x256xf32>, i32 -> vector<2x256xf32>
    %c255_i32_24 = arith.constant 255 : i32
    %68 = tpu.dynamic_rotate %63 by %c255_i32_24 dim 1 : vector<2x256xf32>, i32 -> vector<2x256xf32>
    %c1_i32_25 = arith.constant 1 : i32
    %69 = tpu.dynamic_rotate %64 by %c1_i32_25 dim 1 : vector<2x256xi32>, i32 -> vector<2x256xi32>
    %70 = arith.cmpi eq, %69, %66 : vector<2x256xi32>
    %71 = arith.select %70, %67, %68 : vector<2x256xi1>, vector<2x256xf32>
    %c2_i32_26 = arith.constant 2 : i32
    %72 = vector.broadcast %c2_i32_26 : i32 to vector<2x256xi32>
    %73 = arith.xori %64, %72 : vector<2x256xi32>
    %c2_i32_27 = arith.constant 2 : i32
    %74 = tpu.dynamic_rotate %71 by %c2_i32_27 dim 1 : vector<2x256xf32>, i32 -> vector<2x256xf32>
    %c254_i32_28 = arith.constant 254 : i32
    %75 = tpu.dynamic_rotate %71 by %c254_i32_28 dim 1 : vector<2x256xf32>, i32 -> vector<2x256xf32>
    %c2_i32_29 = arith.constant 2 : i32
    %76 = tpu.dynamic_rotate %64 by %c2_i32_29 dim 1 : vector<2x256xi32>, i32 -> vector<2x256xi32>
    %77 = arith.cmpi eq, %76, %73 : vector<2x256xi32>
    %78 = arith.select %77, %74, %75 : vector<2x256xi1>, vector<2x256xf32>
    %c4_i32_30 = arith.constant 4 : i32
    %79 = vector.broadcast %c4_i32_30 : i32 to vector<2x256xi32>
    %80 = arith.xori %64, %79 : vector<2x256xi32>
    %c4_i32_31 = arith.constant 4 : i32
    %81 = tpu.dynamic_rotate %78 by %c4_i32_31 dim 1 : vector<2x256xf32>, i32 -> vector<2x256xf32>
    %c252_i32_32 = arith.constant 252 : i32
    %82 = tpu.dynamic_rotate %78 by %c252_i32_32 dim 1 : vector<2x256xf32>, i32 -> vector<2x256xf32>
    %c4_i32_33 = arith.constant 4 : i32
    %83 = tpu.dynamic_rotate %64 by %c4_i32_33 dim 1 : vector<2x256xi32>, i32 -> vector<2x256xi32>
    %84 = arith.cmpi eq, %83, %80 : vector<2x256xi32>
    %85 = arith.select %84, %81, %82 : vector<2x256xi1>, vector<2x256xf32>
    %c8_i32_34 = arith.constant 8 : i32
    %86 = vector.broadcast %c8_i32_34 : i32 to vector<2x256xi32>
    %87 = arith.xori %64, %86 : vector<2x256xi32>
    %c8_i32_35 = arith.constant 8 : i32
    %88 = tpu.dynamic_rotate %85 by %c8_i32_35 dim 1 : vector<2x256xf32>, i32 -> vector<2x256xf32>
    %c248_i32_36 = arith.constant 248 : i32
    %89 = tpu.dynamic_rotate %85 by %c248_i32_36 dim 1 : vector<2x256xf32>, i32 -> vector<2x256xf32>
    %c8_i32_37 = arith.constant 8 : i32
    %90 = tpu.dynamic_rotate %64 by %c8_i32_37 dim 1 : vector<2x256xi32>, i32 -> vector<2x256xi32>
    %91 = arith.cmpi eq, %90, %87 : vector<2x256xi32>
    %92 = arith.select %91, %88, %89 : vector<2x256xi1>, vector<2x256xf32>
    %c0_38 = arith.constant 0 : index
    %c0_39 = arith.constant 0 : index
    %c0_40 = arith.constant 0 : index
    %93 = vector.load %arg5[%c0_38, %c0_39, %c0_40] : memref<1x2x256xf32, #tpu.memory_space<vmem>>, vector<1x2x256xf32>
    %94 = vector.shape_cast %93 : vector<1x2x256xf32> to vector<2x256xf32>
    %95 = vector.shape_cast %92 : vector<2x256xf32> to vector<1x2x256xf32>
    tpu.vector_store %arg5[%c0_38, %c0_39, %c0_40], %95 {strides = array<i32>} : memref<1x2x256xf32, #tpu.memory_space<vmem>>, vector<1x2x256xf32>,
    return
  }
  func.func @transform_0(%arg0: i32, %arg1: i32) -> (i32, i32, i32) {
    %c0_i32 = arith.constant 0 : i32
    %c0_i32_0 = arith.constant 0 : i32
    return %arg0, %c0_i32, %arg1 : i32, i32, i32
  }
  func.func @transform_1(%arg0: i32, %arg1: i32) -> (i32, i32, i32) {
    %c0_i32 = arith.constant 0 : i32
    %c0_i32_0 = arith.constant 0 : i32
    return %arg0, %c0_i32, %arg1 : i32, i32, i32
  }
  func.func @transform_2(%arg0: i32, %arg1: i32) -> (i32, i32, i32) {
    %c0_i32 = arith.constant 0 : i32
    %c0_i32_0 = arith.constant 0 : i32
    return %arg0, %c0_i32, %arg1 : i32, i32, i32
  }
  func.func @transform_3(%arg0: i32, %arg1: i32) -> (i32, i32, i32) {
    %c0_i32 = arith.constant 0 : i32
    %c0_i32_0 = arith.constant 0 : i32
    return %arg0, %c0_i32, %arg1 : i32, i32, i32
  }
}

</mosaic_0001>

<bundles_post_ra>
// kernel: tpu_custom_call.1
= control target key start
LH: loop header
LB: loop body
LE: loop exit
PB: predicated region body
PF: predicated region fallthrough
CT: control target
= control target key end

     0   :  { %9 = vsyncpa [#allocation3], 0  ;;  %s1416_s0 = inlined_call_operand.hbm [shape: f32[2,4,256], index: 0, kind: input, shape index: {}]   ;;  %s1417_s1 = inlined_call_operand.hbm [shape: f32[2,2,256], index: 1, kind: input, shape index: {}]   ;;  %s1418_s2 = inlined_call_operand.hbm [shape: f32[2,4,256], index: 2, kind: output, shape index: {0}]   ;;  %s1419_s3 = inlined_call_operand.hbm [shape: f32[2,2,256], index: 3, kind: output, shape index: {1}]  }
   0x1   :  { %11 = vsyncpa [#allocation3 + $0x1], 0 }
   0x2   :  { %12 = vsyncpa [#allocation6], 0 }
   0x3   :  { %14 = vsyncpa [#allocation6 + $0x1], 0 }
   0x4   :  { %15 = vsyncpa [#allocation4], 0 }
   0x5   :  { %17 = vsyncpa [#allocation4 + $0x1], 0 }
   0x6   :  { %18 = vsyncpa [#allocation9], 0 }
   0x7   :  { %20 = vsyncpa [#allocation9 + $0x1], 0  ;;  %s1012_s12 = smov 0   ;;  %s1014_s13 = smov 0  }
   0x8   :  { %s1016_s14 = smov 0   ;;  %s1018_s15 = smov 0  }
   0x9   :  { %s1020_s16 = smov 0   ;;  %s1022_s17 = smov 0  }
   0xa LB: > { %s694_s18 = sadd.s32 4294967295, %s975_s17   ;;  %s695_s19 = sadd.s32 4294967294, %s975_s17   ;;  %s975_s17 = sphi %s1022_s17, %s26_s17   ;;  %s971_s16 = sphi %s1020_s16, %s1447_s16   ;;  %s967_s15 = sphi %s1018_s15, %s1446_s15   ;;  %s963_s14 = sphi %s1016_s14, %s1445_s14   ;;  %s959_s13 = sphi %s1014_s13, %s1444_s13   ;;  %s955_s12 = sphi %s1012_s12, %s1443_s12  }
   0xb   : > { %s38_s20 = sadd.s32 1, %s971_s16  ;;  %s47_s21 = sadd.s32 1, %s963_s14 }
   0xc   : > { %p40_p0 = scmp.ge.s32.totalorder %s38_s20, 2  ;;  %p54_p1 = scmp.ne.s32.totalorder %s963_s14, %s959_s13 }
   0xd   : > { %p55_p2 = scmp.eq.s32.totalorder %s975_s17, 0  ;;  %p60_p3 = scmp.ne.s32.totalorder %s959_s13, %s955_s12 }
   0xe   : > { %s1449_s20 = smov (%p40_p0, %s38_s20), 0  ;;  %p61_p5 = scmp.eq.s32.totalorder %s694_s18, 0 }
   0xf   : > { %p1053_p4 = por %p55_p2, %p54_p1  ;;  %s42_s23 = ssub.s32 %s971_s16, %s1449_s20 }
  0x10   : > { %p114_p6 = scmp.eq.s32.totalorder %s694_s18, 1  ;;  %p45_p7 = scmp.eq.s32.totalorder %s42_s23, 0 }
  0x11   : > { %p1059_p8 = por %p61_p5, %p60_p3  ;;  %p120_p10 = scmp.eq.s32.totalorder %s695_s19, 1 }
  0x12   : > { %p1063_p9 = por %p114_p6, %p54_p1  ;;  %p744_p13 = scmp.lt.s32.totalorder %s975_s17, 2 }
  0x13   : > { %s1068_s26 = scalar_select %p45_p7, %s963_s14, %s47_s21  }
  0x14   : > { %p1070_p11 = por %p120_p10, %p60_p3  ;;  %s1077_s28 = sand.u32 1, %s963_s14  }
  0x15   : > { %s698_s29 = sshll.u32 %s1077_s28, 3  ;;  %s718_s30 = sshll.u32 %s971_s16, 7 }
  0x16   : > { %s180_s6 = scalar_lea.hbm %s1416_s0, %s718_s30  ;;  %s172_s7 = scalar_lea.vmem [#allocation2], %s698_s29 }
  0x17   : > { %s182_s8 = sshll.u32 %s172_s7, 4  ;;  %p1086_p0 = pnand %p744_p13, %p1053_p4  ;;  %s183_s8 = int_to_ptr.vmem [resolvable:$true] %s182_s8 }
  0x18   : > { %p704_p1 = scmp.ge.s32.totalorder %s975_s17, 1  ;;  %p208_p2 = scmp.lt.s32.totalorder %s975_s17, 3 }
  0x19   : > { %s169_s10 = scalar_lea.sflag [#allocation3], %s1077_s28  ;;  %p807_p3 = pneg %p1086_p0 }
  0x1a   : > { %s818_s11 = scalar_lea.vmem %s183_s8, 128  ;;  %s977_s18 = smov [#allocation2]  }
  0x1b   : > { %p819_p5 = scmp.ne.s32.totalorder %s183_s8, %s818_s11  ;;  %s823_s19 = sshll.u32 %s977_s18, 4  ;;  %s824_s19 = int_to_ptr.vmem [resolvable:$false] %s823_s19 }
  0x1c   : > { %s825_s21 = scalar_lea.vmem %s824_s19, 256  ;;  %p826_p4 = scmp.lt.s32.totalorder %s183_s8, %s824_s19 }
  0x1d   : > { %p821_p6 = pnand %p819_p5, %p807_p3  ;;  %p827_p10 = scmp.lt.s32.totalorder %s825_s21, %s818_s11 }
  0x1f   : > { %p822_p7 = pneg %p821_p6  ;;  %p828_p13 = por %p827_p10, %p826_p4 }
  0x21   : > { %p829_p12 = pnand %p828_p13, %p822_p7 }
  0x23   : > { %832 = shalt.err (!%p829_p12)
}
  0x24   : > { %733 = dma.hbm_to_vmem [thread:$0]  (!%p1086_p0), %s180_s6, 128, %s183_s8, %s169_s10  }
  0x25   : > { %p1104_p5 = pnand %p704_p1, %p208_p2  ;;  %s701_s23 = sshll.u32 %s1077_s28, 2 }
  0x26   : > { %s719_s29 = sshll.u32 %s971_s16, 6  ;;  %s193_s7 = scalar_lea.vmem [#allocation5], %s701_s23 }
  0x27   : > { %s201_s5 = scalar_lea.hbm %s1417_s1, %s719_s29  ;;  %s203_s11 = sshll.u32 %s193_s7, 4  ;;  %s204_s11 = int_to_ptr.vmem [resolvable:$true] %s203_s11 }
  0x28   : > { %s190_s18 = scalar_lea.sflag [#allocation6], %s1077_s28  ;;  %s846_s19 = scalar_lea.vmem %s204_s11, 64 }
  0x29   : > { %p847_p12 = scmp.ne.s32.totalorder %s204_s11, %s846_s19  ;;  %s978_s6 = smov [#allocation5]  }
  0x2a   : > { %s851_s8 = sshll.u32 %s978_s6, 4  ;;  %s852_s8 = int_to_ptr.vmem [resolvable:$false] %s851_s8 }
  0x2b   : > { %p849_p6 = pnand %p847_p12, %p807_p3  ;;  %s853_s10 = scalar_lea.vmem %s852_s8, 128 }
  0x2c   : > { %p854_p1 = scmp.lt.s32.totalorder %s204_s11, %s852_s8  ;;  %p855_p2 = scmp.lt.s32.totalorder %s853_s10, %s846_s19 }
  0x2d   : > { %p850_p7 = pneg %p849_p6 }
  0x2e   : > { %p856_p4 = por %p855_p2, %p854_p1 }
  0x30   : > { %p857_p10 = pnand %p856_p4, %p850_p7 }
  0x32   : > { %860 = shalt.err (!%p857_p10)
}
  0x33   : > { %736 = dma.hbm_to_vmem [thread:$0]  (!%p1086_p0), %s201_s5, 64, %s204_s11, %s190_s18  }
  0x34   : > { %212 = sbr.rel (%p1104_p5) target bundleno = 604 (0x25c), region = 28  ;;  %s1122_s28 = sand.u32 (!%p1104_p5), 1, %s959_s13  }
  0x35   : > { %s705_s21 = sshll.u32 (!%p1104_p5), %s1122_s28, 3  ;;  %s215_s23 = scalar_lea.sflag (!%p1104_p5), [#allocation3], %s1122_s28 }
  0x36   : > { %s1128_s29 = scalar_lea.vmem (!%p1104_p5), [#allocation2], %s705_s21 }
  0x39   : > { %938 = dma.done.wait (%p1059_p8), %s215_s23, 128  }
  0x3a   : > { %940 = vsyncadd (%p1059_p8), %s215_s23, 4294967168  ;;  %s706_s9 = sshll.u32 %s1122_s28, 2  ;;  %s224_s22 = scalar_lea.sflag [#allocation6], %s1122_s28 }
  0x3b   : > { %s1138_s30 = scalar_lea.vmem [#allocation5], %s706_s9 }
  0x3c   : > { %942 = dma.done.wait (%p1059_p8), %s224_s22, 64  }
  0x3d   : > { %944 = vsyncadd (%p1059_p8), %s224_s22, 4294967232  ;;  %v265_v0 = vlaneseq  ;;  %v979_v1 = vmov 839922192   ;;  %v980_v5 = vmov 269488144   ;;  %s981_s4 = smov 1  }
  0x3e   : > { %v272_v2 = vunpack.c.l.s4 %v979_v1  ;;  %v413_v6 = vunpack.c.l.s4 %v980_v5  ;;  %v982_v12 = vmov 1983009808   ;;  %v264_v22 = vld [vmem:[%s1128_s29] sm:$0xff]  ;;  %v406_v27 = vld [vmem:[%s1138_s30] sm:$0xf]  ;;  %s983_s24 = smov 127  }
  0x3f   : > { %v1144_v3 = vand.u32 127, %v265_v0  ;;  %v266_v4 = vshrl.u32 %v265_v0, 7  ;;  %v434_v13 = vunpack.c.l.s4 %v982_v12  ;;  %s984_s5 = smov 2   ;;  %s985_s7 = smov 126  }
  0x40   : > { %v273_v7 = vunpack.c.0.s8 %v272_v2  ;;  %v414_v11 = vunpack.c.0.s8 %v413_v6  ;;  %s986_s11 = smov 4   ;;  %s987_s18 = smov 124  }
  0x41   : > { %313 = vrot.lane.b32.xlu0 %v1144_v3, %s981_s4  ;;  %v1149_v8 = vadd.s32 128, %v1144_v3  ;;  %v267_v9 = vcvt.s32.f32 %v266_v4  ;;  %v407_v10 = vadd.s32 4, %v266_v4  ;;  %v435_v26 = vunpack.c.0.s8 %v434_v13  ;;  %s988_s19 = smov 8   ;;  %s989_s6 = smov 120  }
  0x42   : > { %v276_v15 = vsub.s32 %v273_v7, %v266_v4  ;;  %v417_v20 = vsub.s32 %v414_v11, %v266_v4  ;;  %vm303_vm0 = vcmp.lt.s32.totalorder %v1144_v3, 1  ;;  %v294_v42 = vxor.u32 1, %v1144_v3  ;;  %s720_s8 = sshll.u32 %s967_s15, 7  ;;  %s252_s10 = scalar_lea.vmem [#allocation7], %s705_s21 }
  0x43   : > { %v268_v14 = vmul.f32 0.1, %v267_v9  ;;  %v280_v16 = vmul.f32 0.01, %v267_v9  ;;  %v408_v17 = vcvt.s32.f32 %v407_v10  ;;  %v438_v33 = vsub.s32 %v435_v26, %v266_v4  ;;  %s533_s23 = sshll.u32 %s252_s10, 4  ;;  %s1337_s22 = scalar_lea.hbm %s1418_s2, %s720_s8  ;;  %s1339_s23 = int_to_ptr.vmem [resolvable:$true] %s533_s23 }
  0x44   : > { %v295_v43 = vxor.u32 1, %v1149_v8  ;;  %vm310_vm1 = vcmp.lt.s32.totalorder %v1144_v3, 127  ;;  %vm329_vm4 = vcmp.lt.s32.totalorder %v1144_v3, 2  ;;  %v323_v5 = vxor.u32 2, %v1144_v3  ;;  %s512_s30 = scalar_lea.sflag [#allocation4], %s1122_s28 }
  0x45   : > { %315 = vrot.lane.b32.xlu0 %v1149_v8, %s981_s4  ;;  %v269_v18 = vadd.f32 1.0, %v268_v14  ;;  %v409_v19 = vmul.f32 0.1, %v408_v17  ;;  %v421_v21 = vmul.f32 0.01, %v408_v17  ;;  %v288_v24 = vrot.slane %v280_v16, %v276_v15 }
  0x46   : > { %v324_v6 = vxor.u32 2, %v1149_v8  ;;  %vm336_vm5 = vcmp.lt.s32.totalorder %v1144_v3, 126  ;;  %vm355_vm8 = vcmp.lt.s32.totalorder %v1144_v3, 4  ;;  %vm362_vm9 = vcmp.lt.s32.totalorder %v1144_v3, 124 }
  0x47   : > { %v277_v23 = vrot.slane %v269_v18, %v276_v15  ;;  %v410_v25 = vadd.f32 1.0, %v409_v19  ;;  %v429_v30 = vrot.slane %v421_v21, %v417_v20  ;;  %vm381_vm12 = vcmp.lt.s32.totalorder %v1144_v3, 8 }
  0x48   : > { %vm388_vm13 = vcmp.lt.s32.totalorder %v1144_v3, 120 }
  0x49   : > { %v279_v28 = vmul.f32 %v277_v23, %v264_v22  ;;  %v418_v29 = vrot.slane %v410_v25, %v417_v20 }
  0x4b   : > { %v290_v31 = vadd.f32 %v288_v24, %v279_v28  ;;  %v420_v32 = vmul.f32 %v418_v29, %v406_v27 }
  0x4d   : > { %299 = vrot.lane.b32.xlu1 %v290_v31, %s981_s4  ;;  %v297_v34 = vcombine.high %v290_v31, %v290_v31  ;;  %306 = vrot.lane.b32.xlu0 %v290_v31, %s983_s24  ;;  %v431_v35 = vadd.f32 %v429_v30, %v420_v32 }
  0x4f   : > { %v439_v36 = vrot.slane %v431_v35, %v438_v33  ;;  %v350_v35 = vxor.u32 4, %v1149_v8 }
  0x51   : > { %301 = vrot.lane.b32.xlu1 %v297_v34, %s981_s4  ;;  %443 = vrot.lane.b32.xlu0 %v439_v36, %s981_s4  ;;  %v440_v37 = vcombine.high %v439_v36, %v439_v36 }
  0x55   : > { %308 = vrot.lane.b32.xlu1 %v297_v34, %s983_s24  ;;  %449 = vrot.lane.b32.xlu0 %v439_v36, %s983_s24  ;;  %v349_v34 = vxor.u32 4, %v1144_v3 }
  0x59   : > { %445 = vrot.lane.b32.xlu1 %v440_v37, %s981_s4  ;;  %339 = vrot.lane.b32.xlu0 %v1144_v3, %s984_s5  ;;  %s861_s4 = scalar_lea.vmem %s1339_s23, 128 }
  0x5a   : > { %p862_p8 = scmp.ne.s32.totalorder %s1339_s23, %s861_s4 }
  0x5c   : > { %p863_p0 = pnand %p862_p8, %p1063_p9 }
  0x5d   : > { %451 = vrot.lane.b32.xlu1 %v440_v37, %s983_s24  ;;  %s990_s24 = smov [#allocation7]  }
  0x5e   : > { %p864_p3 = pneg %p863_p0 }
  0x61   : > { %341 = vrot.lane.b32.xlu1 %v1149_v8, %s984_s5 }
  0xb3   : > { %v314_v38 = vpop.permute.xlu0 %313 }
  0xb7   : > { %v316_v39 = vpop.permute.xlu0 %315 }
  0xb8   : > { %v317_v45 = vsel %vm303_vm0, %v314_v38, %v316_v39  ;;  %v318_v46 = vsel %vm303_vm0, %v316_v39, %v314_v38 }
  0xb9   : > { %vm1171_vm2 = vcmp.eq.s32.totalorder %v318_v46, %v294_v42  ;;  %vm1175_vm3 = vcmp.eq.s32.totalorder %v317_v45, %v295_v43 }
  0xbf   : > { %v300_v40 = vpop.permute.xlu1 %299  ;;  %v307_v41 = vpop.permute.xlu0 %306 }
  0xc3   : > { %v302_v44 = vpop.permute.xlu1 %301  ;;  %v444_v50 = vpop.permute.xlu0 %443 }
  0xc4   : > { %v304_v51 = vsel %vm303_vm0, %v300_v40, %v302_v44  ;;  %v305_v52 = vsel %vm303_vm0, %v302_v44, %v300_v40 }
  0xc7   : > { %v309_v49 = vpop.permute.xlu1 %308  ;;  %v450_v58 = vpop.permute.xlu0 %449 }
  0xc8   : > { %v311_v53 = vsel %vm310_vm1, %v307_v41, %v309_v49  ;;  %v312_v54 = vsel %vm310_vm1, %v309_v49, %v307_v41 }
  0xc9   : > { %v322_v55 = vsel %vm1175_vm3, %v304_v51, %v312_v54  ;;  %v321_v56 = vsel %vm1171_vm2, %v305_v52, %v311_v53 }
  0xca   : > { %327 = vrot.lane.b32.xlu1 %v322_v55, %s984_s5  ;;  %325 = vrot.lane.b32.xlu0 %v321_v56, %s984_s5 }
  0xcb   : > { %v446_v57 = vpop.permute.xlu1 %445  ;;  %v340_v2 = vpop.permute.xlu0 %339 }
  0xcc   : > { %v447_v60 = vsel %vm303_vm0, %v444_v50, %v446_v57  ;;  %v448_v61 = vsel %vm303_vm0, %v446_v57, %v444_v50 }
  0xce   : > { %334 = vrot.lane.b32.xlu1 %v322_v55, %s985_s7  ;;  %332 = vrot.lane.b32.xlu0 %v321_v56, %s985_s7 }
  0xcf   : > { %v452_v59 = vpop.permute.xlu1 %451 }
  0xd0   : > { %v453_v62 = vsel %vm310_vm1, %v450_v58, %v452_v59  ;;  %v454_v63 = vsel %vm310_vm1, %v452_v59, %v450_v58 }
  0xd1   : > { %v456_v0 = vsel %vm1175_vm3, %v447_v60, %v454_v63  ;;  %v455_v1 = vsel %vm1171_vm2, %v448_v61, %v453_v62  ;;  %v375_v62 = vxor.u32 8, %v1144_v3  ;;  %v376_v63 = vxor.u32 8, %v1149_v8 }
  0xd2   : > { %459 = vrot.lane.b32.xlu1 %v456_v0, %s984_s5  ;;  %457 = vrot.lane.b32.xlu0 %v455_v1, %s984_s5  ;;  %s865_s5 = sshll.u32 %s990_s24, 4  ;;  %s866_s5 = int_to_ptr.vmem [resolvable:$false] %s865_s5 }
  0xd3   : > { %v342_v4 = vpop.permute.xlu1 %341  ;;  %p868_p13 = scmp.lt.s32.totalorder %s1339_s23, %s866_s5 }
  0xd4   : > { %v343_v10 = vsel %vm329_vm4, %v340_v2, %v342_v4  ;;  %v344_v11 = vsel %vm329_vm4, %v342_v4, %v340_v2 }
  0xd5   : > { %vm1219_vm6 = vcmp.eq.s32.totalorder %v344_v11, %v323_v5  ;;  %vm1223_vm7 = vcmp.eq.s32.totalorder %v343_v10, %v324_v6 }
  0xd6   : > { %465 = vrot.lane.b32.xlu1 %v456_v0, %s985_s7  ;;  %463 = vrot.lane.b32.xlu0 %v455_v1, %s985_s7  ;;  %s867_s7 = scalar_lea.vmem %s866_s5, 256 }
  0xd7   : > { %p869_p5 = scmp.lt.s32.totalorder %s867_s7, %s861_s4 }
  0xd9   : > { %p870_p12 = por %p869_p5, %p868_p13 }
  0xda   : > { %367 = vrot.lane.b32.xlu1 %v1149_v8, %s986_s11  ;;  %365 = vrot.lane.b32.xlu0 %v1144_v3, %s986_s11 }
  0xdb   : > { %p871_p6 = pnand %p870_p12, %p864_p3 }
 0x13c   : > { %v326_v7 = vpop.permute.xlu0 %325  ;;  %v328_v9 = vpop.permute.xlu1 %327 }
 0x13d   : > { %v330_v16 = vsel %vm329_vm4, %v326_v7, %v328_v9  ;;  %v331_v17 = vsel %vm329_vm4, %v328_v9, %v326_v7 }
 0x140   : > { %v333_v14 = vpop.permute.xlu0 %332  ;;  %v335_v15 = vpop.permute.xlu1 %334 }
 0x141   : > { %v337_v18 = vsel %vm336_vm5, %v333_v14, %v335_v15  ;;  %v338_v19 = vsel %vm336_vm5, %v335_v15, %v333_v14 }
 0x142   : > { %v348_v20 = vsel %vm1223_vm7, %v330_v16, %v338_v19  ;;  %v347_v21 = vsel %vm1219_vm6, %v331_v17, %v337_v18 }
 0x143   : > { %353 = vrot.lane.b32.xlu1 %v348_v20, %s986_s11  ;;  %351 = vrot.lane.b32.xlu0 %v347_v21, %s986_s11 }
 0x144   : > { %v458_v22 = vpop.permute.xlu0 %457  ;;  %v460_v23 = vpop.permute.xlu1 %459 }
 0x145   : > { %v461_v26 = vsel %vm329_vm4, %v458_v22, %v460_v23  ;;  %v462_v27 = vsel %vm329_vm4, %v460_v23, %v458_v22 }
 0x147   : > { %360 = vrot.lane.b32.xlu1 %v348_v20, %s987_s18  ;;  %358 = vrot.lane.b32.xlu0 %v347_v21, %s987_s18 }
 0x148   : > { %v464_v24 = vpop.permute.xlu0 %463  ;;  %v466_v25 = vpop.permute.xlu1 %465 }
 0x149   : > { %v467_v28 = vsel %vm336_vm5, %v464_v24, %v466_v25  ;;  %v468_v29 = vsel %vm336_vm5, %v466_v25, %v464_v24 }
 0x14a   : > { %v470_v30 = vsel %vm1223_vm7, %v461_v26, %v468_v29  ;;  %v469_v31 = vsel %vm1219_vm6, %v462_v27, %v467_v28 }
 0x14b   : > { %473 = vrot.lane.b32.xlu1 %v470_v30, %s986_s11  ;;  %471 = vrot.lane.b32.xlu0 %v469_v31, %s986_s11 }
 0x14c   : > { %v366_v32 = vpop.permute.xlu0 %365  ;;  %v368_v33 = vpop.permute.xlu1 %367 }
 0x14d   : > { %v369_v38 = vsel %vm355_vm8, %v366_v32, %v368_v33  ;;  %v370_v39 = vsel %vm355_vm8, %v368_v33, %v366_v32 }
 0x14e   : > { %vm1267_vm10 = vcmp.eq.s32.totalorder %v370_v39, %v349_v34  ;;  %vm1271_vm11 = vcmp.eq.s32.totalorder %v369_v38, %v350_v35 }
 0x14f   : > { %479 = vrot.lane.b32.xlu1 %v470_v30, %s987_s18  ;;  %477 = vrot.lane.b32.xlu0 %v469_v31, %s987_s18 }
 0x153   : > { %393 = vrot.lane.b32.xlu1 %v1149_v8, %s988_s19  ;;  %391 = vrot.lane.b32.xlu0 %v1144_v3, %s988_s19 }
 0x1b5   : > { %v352_v36 = vpop.permute.xlu0 %351  ;;  %v354_v37 = vpop.permute.xlu1 %353 }
 0x1b6   : > { %v356_v44 = vsel %vm355_vm8, %v352_v36, %v354_v37  ;;  %v357_v45 = vsel %vm355_vm8, %v354_v37, %v352_v36 }
 0x1b9   : > { %v359_v42 = vpop.permute.xlu0 %358  ;;  %v361_v43 = vpop.permute.xlu1 %360 }
 0x1ba   : > { %v363_v46 = vsel %vm362_vm9, %v359_v42, %v361_v43  ;;  %v364_v47 = vsel %vm362_vm9, %v361_v43, %v359_v42 }
 0x1bb   : > { %v374_v48 = vsel %vm1271_vm11, %v356_v44, %v364_v47  ;;  %v373_v49 = vsel %vm1267_vm10, %v357_v45, %v363_v46 }
 0x1bc   : > { %379 = vrot.lane.b32.xlu1 %v374_v48, %s988_s19  ;;  %377 = vrot.lane.b32.xlu0 %v373_v49, %s988_s19 }
 0x1bd   : > { %v472_v50 = vpop.permute.xlu0 %471  ;;  %v474_v51 = vpop.permute.xlu1 %473 }
 0x1be   : > { %v475_v54 = vsel %vm355_vm8, %v472_v50, %v474_v51  ;;  %v476_v55 = vsel %vm355_vm8, %v474_v51, %v472_v50 }
 0x1c0   : > { %386 = vrot.lane.b32.xlu1 %v374_v48, %s989_s6  ;;  %384 = vrot.lane.b32.xlu0 %v373_v49, %s989_s6 }
 0x1c1   : > { %v478_v52 = vpop.permute.xlu0 %477  ;;  %v480_v53 = vpop.permute.xlu1 %479 }
 0x1c2   : > { %v481_v56 = vsel %vm362_vm9, %v478_v52, %v480_v53  ;;  %v482_v57 = vsel %vm362_vm9, %v480_v53, %v478_v52 }
 0x1c3   : > { %v484_v58 = vsel %vm1271_vm11, %v475_v54, %v482_v57  ;;  %v483_v59 = vsel %vm1267_vm10, %v476_v55, %v481_v56 }
 0x1c4   : > { %487 = vrot.lane.b32.xlu1 %v484_v58, %s988_s19  ;;  %485 = vrot.lane.b32.xlu0 %v483_v59, %s988_s19 }
 0x1c5   : > { %v392_v60 = vpop.permute.xlu0 %391  ;;  %v394_v61 = vpop.permute.xlu1 %393 }
 0x1c6   : > { %v395_v2 = vsel %vm381_vm12, %v392_v60, %v394_v61  ;;  %v396_v4 = vsel %vm381_vm12, %v394_v61, %v392_v60 }
 0x1c7   : > { %vm1311_vm14 = vcmp.eq.s32.totalorder %v396_v4, %v375_v62  ;;  %vm1315_vm15 = vcmp.eq.s32.totalorder %v395_v2, %v376_v63 }
 0x1c8   : > { %493 = vrot.lane.b32.xlu1 %v484_v58, %s989_s6  ;;  %491 = vrot.lane.b32.xlu0 %v483_v59, %s989_s6 }
 0x22e   : > { %v378_v0 = vpop.permute.xlu0 %377  ;;  %v380_v1 = vpop.permute.xlu1 %379 }
 0x22f   : > { %v382_v9 = vsel %vm381_vm12, %v378_v0, %v380_v1  ;;  %v383_v10 = vsel %vm381_vm12, %v380_v1, %v378_v0 }
 0x232   : > { %v385_v7 = vpop.permute.xlu0 %384  ;;  %v387_v8 = vpop.permute.xlu1 %386 }
 0x233   : > { %v389_v11 = vsel %vm388_vm13, %v385_v7, %v387_v8  ;;  %v390_v12 = vsel %vm388_vm13, %v387_v8, %v385_v7 }
 0x234   : > { %v399_v13 = vsel %vm1311_vm14, %v383_v10, %v389_v11  ;;  %v400_v14 = vsel %vm1315_vm15, %v382_v9, %v390_v12 }
 0x235   : > { %v403_v15 = vcombine.low %v399_v13, %v400_v14 }
 0x236   : > { %v486_v16 = vpop.permute.xlu0 %485  ;;  %v488_v17 = vpop.permute.xlu1 %487 }
 0x237   : > { %405 = vst [vmem:[%s252_s10] sm:$0xff] %v403_v15 }
 0x238   : > { %874 = shalt.err (!%p871_p6)
}
 0x239   : > { %s875_s11 = scalar_lea.hbm %s1337_s22, 128  ;;  %s879_s6 = scalar_lea.hbm %s1418_s2, 256 }
 0x23a   : > { %p876_p7 = scmp.ne.s32.totalorder %s1337_s22, %s875_s11  ;;  %p880_p4 = scmp.lt.s32.totalorder %s1337_s22, %s1418_s2 }
 0x23b   : > { %p881_p10 = scmp.lt.s32.totalorder %s879_s6, %s875_s11 }
 0x23c   : > { %p877_p1 = pnand %p876_p7, %p1063_p9 }
 0x23d   : > { %p882_p8 = por %p881_p10, %p880_p4 }
 0x23e   : > { %p878_p2 = pneg %p877_p1 }
 0x240   : > { %p883_p0 = pnand %p882_p8, %p878_p2 }
 0x242   : > { %886 = shalt.err (!%p883_p0)
}
 0x243   : > { %726 = dma.vmem_to_hbm [thread:$0]  (%p1063_p9), %s1339_s23, 128, %s1337_s22, %s512_s30   ;;  %v492_v18 = vpop.permute.xlu0 %491  ;;  %v494_v19 = vpop.permute.xlu1 %493  ;;  %v489_v20 = vsel %vm381_vm12, %v486_v16, %v488_v17  ;;  %v490_v21 = vsel %vm381_vm12, %v488_v17, %v486_v16 }
 0x244   : > { %s721_s21 = sshll.u32 %s967_s15, 6  ;;  %s259_s29 = scalar_lea.vmem [#allocation8], %s706_s9  ;;  %v495_v22 = vsel %vm388_vm13, %v492_v18, %v494_v19  ;;  %v496_v23 = vsel %vm388_vm13, %v494_v19, %v492_v18 }
 0x245   : > { %s549_s4 = sshll.u32 %s259_s29, 4  ;;  %v497_v24 = vsel %vm1311_vm14, %v490_v21, %v495_v22  ;;  %v498_v25 = vsel %vm1315_vm15, %v489_v20, %v496_v23  ;;  %s547_s23 = scalar_lea.hbm %s1419_s3, %s721_s21  ;;  %s550_s4 = int_to_ptr.vmem [resolvable:$true] %s549_s4 }
 0x246   : > { %v501_v26 = vcombine.low %v497_v24, %v498_v25  ;;  %s517_s22 = scalar_lea.sflag [#allocation9], %s1122_s28  ;;  %s887_s30 = scalar_lea.vmem %s550_s4, 64 }
 0x247   : > { %p888_p3 = scmp.ne.s32.totalorder %s550_s4, %s887_s30  ;;  %s991_s24 = smov [#allocation8]  }
 0x248   : > { %709 = vst.sshfl [vmem:[%s259_s29] sm:$0x33 pattern:$0x76325410] %v501_v26  ;;  %s891_s5 = sshll.u32 %s991_s24, 4  ;;  %s892_s5 = int_to_ptr.vmem [resolvable:$false] %s891_s5 }
 0x249   : > { %p889_p13 = pnand %p888_p3, %p1063_p9  ;;  %s893_s7 = scalar_lea.vmem %s892_s5, 128 }
 0x24a   : > { %p894_p12 = scmp.lt.s32.totalorder %s550_s4, %s892_s5  ;;  %p895_p6 = scmp.lt.s32.totalorder %s893_s7, %s887_s30 }
 0x24b   : > { %p890_p5 = pneg %p889_p13 }
 0x24c   : > { %p896_p7 = por %p895_p6, %p894_p12 }
 0x24e   : > { %p897_p1 = pnand %p896_p7, %p890_p5 }
 0x250   : > { %900 = shalt.err (!%p897_p1)
}
 0x251   : > { %s901_s11 = scalar_lea.hbm %s547_s23, 64  ;;  %s905_s19 = scalar_lea.hbm %s1419_s3, 128 }
 0x252   : > { %p902_p2 = scmp.ne.s32.totalorder %s547_s23, %s901_s11  ;;  %p906_p8 = scmp.lt.s32.totalorder %s547_s23, %s1419_s3 }
 0x253   : > { %p907_p0 = scmp.lt.s32.totalorder %s905_s19, %s901_s11 }
 0x254   : > { %p903_p4 = pnand %p902_p2, %p1063_p9 }
 0x255   : > { %p908_p3 = por %p907_p0, %p906_p8 }
 0x256   : > { %p904_p10 = pneg %p903_p4 }
 0x258   : > { %p909_p13 = pnand %p908_p3, %p904_p10 }
 0x25a   : > { %912 = shalt.err (!%p909_p13)
}
 0x25b   : > { %727 = dma.vmem_to_hbm [thread:$0]  (%p1063_p9), %s550_s4, 64, %s547_s23, %s517_s22  }
 0x25c PF: > { %s561_s10 = sand.u32 1, %s955_s12   ;;  %p1442_p5 = scmp.ge.s32.totalorder %s975_s17, 2 }
 0x25d   : > { %s562_s21 = scalar_lea.sflag [#allocation4], %s561_s10 }
 0x25e   : > { %p738_p12 = pnand %p1442_p5, %p1070_p11 }
 0x260   : > { %p739_p6 = pneg %p738_p12 }
 0x262   : > { %946 = dma.done.wait (%p739_p6), %s562_s21, 128  }
 0x263   : > { %948 = vsyncadd (%p739_p6), %s562_s21, 4294967168  ;;  %s571_s29 = scalar_lea.sflag [#allocation9], %s561_s10 }
 0x264   : > { %950 = dma.done.wait (%p739_p6), %s571_s29, 64  }
 0x265   : > { %952 = vsyncadd (%p739_p6), %s571_s29, 4294967232  ;;  %s26_s17 = sadd.s32 1, %s975_s17   ;;  %s1443_s12 = smov %s959_s13 }
 0x266   : > { %p23_p7 = scmp.ge.s32.totalorder %s26_s17, 4   ;;  %s1444_s13 = smov %s963_s14 }
 0x267   : > { %s1445_s14 = smov %s1068_s26  ;;  %s1446_s15 = smov %s971_s16 }
 0x268   : > { %s1447_s16 = smov %s1449_s20  ;;  %25 = sbr.rel (!%p23_p7) target bundleno = 10 (0xa), region = 103 }
 0x26d   :  { %576 = vsyncpa [#allocation3], 1 }
 0x26e   :  { %578 = vsyncpa [#allocation3 + $0x1], 1 }
 0x26f   :  { %579 = vsyncpa [#allocation6], 1 }
 0x270   :  { %581 = vsyncpa [#allocation6 + $0x1], 1 }
 0x271   :  { %582 = vsyncpa [#allocation4], 1 }
 0x272   :  { %584 = vsyncpa [#allocation4 + $0x1], 1 }
 0x273   :  { %585 = vsyncpa [#allocation9], 1 }
 0x274   :  { %587 = vsyncpa [#allocation9 + $0x1], 1 }

</bundles_post_ra>
